<compile_context>
chip_gen: v7x
topology: tpu7x:2x2x1
jax: 0.10.0
libtpu: 0.0.40
codegen_flags: <defaults>
</compile_context>

<pallas_src>
import functools

import jax
import jax.numpy as jnp
from jax import lax
from jax.experimental import pallas as pl
from jax.experimental.pallas import tpu as pltpu


def _shifted_taps(x, K, pad):
    """K zero-padded tap shifts of x along the last (length) axis.

    taps[k][..., l] == x[..., l + k - pad], zero outside [0, L).
    Uses pltpu.roll (XLU slot, no extra copies) + one iota mask when the lane
    dim is a multiple of 128; otherwise a safe slice+zero concatenate.
    """
    L = x.shape[-1]
    last = x.ndim - 1
    use_roll = (L % 128 == 0)
    lane = lax.broadcasted_iota(jnp.int32, x.shape, last) if use_roll else None
    taps = []
    for k in range(K):
        d = k - pad
        if d == 0:
            taps.append(x)
            continue
        if use_roll:
            rolled = pltpu.roll(x, shift=(-d) % L, axis=last)
            valid = jnp.logical_and(lane + d >= 0, lane + d < L)
            taps.append(jnp.where(valid, rolled, jnp.zeros_like(rolled)))
        else:
            z = jnp.zeros(x.shape[:-1] + (abs(d),), x.dtype)
            if d > 0:
                taps.append(jnp.concatenate([x[..., d:], z], axis=last))
            else:
                taps.append(jnp.concatenate([z, x[..., : L + d]], axis=last))
    return taps


def _conv_row(w_ref, taps, b, K):
    """Conv output for batch row b: sum_k W_k @ taps[k][b] -> f32 (C_out, L)."""
    y = None
    for k in range(K):
        yk = jnp.dot(w_ref[k], taps[k][b], preferred_element_type=jnp.float32)
        y = yk if y is None else y + yk
    return y


def _stats_kernel(x_ref, w_ref, sum_ref, ssq_ref, *, K, pad):
    """Per-chunk conv recompute + partial per-channel sum / sum-of-squares."""
    x = x_ref[...]                       # (Bt, C_in, L), input dtype
    block_b = x.shape[0]
    taps = _shifted_taps(x, K, pad)      # shifted once per block, reused per row
    s = None
    q = None
    for b in range(block_b):
        y = _conv_row(w_ref, taps, b, K)             # (C_out, L) f32
        sb = jnp.sum(y, axis=1, keepdims=True)
        qb = jnp.sum(y * y, axis=1, keepdims=True)
        s = sb if s is None else s + sb
        q = qb if q is None else q + qb
    sum_ref[0] = s                       # (C_out, 1) partial for this chunk
    ssq_ref[0] = q


def _conv_bn_relu_kernel(x_ref, w_ref, scale_ref, shift_ref, o_ref, *, K, pad):
    """Recompute conv, apply folded BN scale/shift + ReLU, write output tile."""
    x = x_ref[...]                       # (Bt, C_in, L)
    block_b = x.shape[0]
    taps = _shifted_taps(x, K, pad)
    scale = scale_ref[...]               # (C_out, 1) f32, precomputed in wrapper
    shift = shift_ref[...]               # (C_out, 1) f32
    for b in range(block_b):
        y = _conv_row(w_ref, taps, b, K)
        o_ref[b] = jnp.maximum(y * scale + shift, 0.0).astype(o_ref.dtype)


def _pick_block_b(B, C_in, C_out, L, itemsize, budget_bytes=8 << 20, max_b=8):
    """Largest divisor of B (<= max_b) whose per-step VMEM footprint fits budget."""
    # per batch row inside a block: x row + (K-1) shifted copies + f32 conv row
    # + f32 output row (double-buffering headroom left to the budget margin).
    per_row = 4 * C_in * L * itemsize + 2 * C_out * L * 4
    bt = int(max(1, min(B, max_b, budget_bytes // max(per_row, 1))))
    while B % bt:
        bt -= 1
    return bt


def conv_block_1d(x, weight, gamma, beta, eps=1e-5, block_b=None):
    """Pallas forward of ConvBlock1D: ReLU(BN_train(Conv1d_k3_samepad(x)))."""
    B, C_in, L = x.shape
    C_out, C_in_w, K = weight.shape
    assert C_in == C_in_w
    pad = K // 2

    if block_b is None:
        block_b = _pick_block_b(B, C_in, C_out, L, x.dtype.itemsize)
    nb = B // block_b

    # (K, C_out, C_in): per-tap weight slabs, kept in the input dtype so the MXU
    # runs natively (no f32 upcast of bf16 inputs); accumulation stays f32.
    w3 = jnp.transpose(weight, (2, 0, 1)).astype(x.dtype)

    # ---- Pass 1: conv recompute + per-chunk partial stats (parallel chunks) ----
    psum, pssq = pl.pallas_call(
        functools.partial(_stats_kernel, K=K, pad=pad),
        out_shape=(
            jax.ShapeDtypeStruct((nb, C_out, 1), jnp.float32),
            jax.ShapeDtypeStruct((nb, C_out, 1), jnp.float32),
        ),
        grid=(nb,),
        in_specs=[
            pl.BlockSpec((block_b, C_in, L), lambda i: (i, 0, 0)),
            pl.BlockSpec((K, C_out, C_in), lambda i: (0, 0, 0)),
        ],
        out_specs=(
            pl.BlockSpec((1, C_out, 1), lambda i: (i, 0, 0)),
            pl.BlockSpec((1, C_out, 1), lambda i: (i, 0, 0)),
        ),
        compiler_params=pltpu.CompilerParams(
            dimension_semantics=("parallel",)),
    )(x, w3)

    # ---- Fold BN into per-channel scale/shift once (tiny (C_out,) JAX math) ----
    n = float(B * L)
    mean = jnp.sum(psum, axis=0) / n                                 # (C_out, 1)
    var = jnp.maximum(jnp.sum(pssq, axis=0) / n - mean * mean, 0.0)  # clamp >= 0
    inv_std = lax.rsqrt(var + jnp.float32(eps))
    scale = gamma.reshape(C_out, 1).astype(jnp.float32) * inv_std
    shift = beta.reshape(C_out, 1).astype(jnp.float32) - mean * scale

    # ---- Pass 2: conv recompute + scale/shift + ReLU, streaming write ----
    out = pl.pallas_call(
        functools.partial(_conv_bn_relu_kernel, K=K, pad=pad),
        out_shape=jax.ShapeDtypeStruct((B, C_out, L), x.dtype),
        grid=(nb,),
        in_specs=[
            pl.BlockSpec((block_b, C_in, L), lambda i: (i, 0, 0)),
            pl.BlockSpec((K, C_out, C_in), lambda i: (0, 0, 0)),
            pl.BlockSpec((C_out, 1), lambda i: (0, 0)),
            pl.BlockSpec((C_out, 1), lambda i: (0, 0)),
        ],
        out_specs=pl.BlockSpec((block_b, C_out, L), lambda i: (i, 0, 0)),
        compiler_params=pltpu.CompilerParams(
            dimension_semantics=("parallel",)),
    )(x, w3, scale, shift)
    return out


if __name__ == "__main__":
    key = jax.random.PRNGKey(0)
    k1, k2, k3, k4 = jax.random.split(key, 4)

    B, C_in, C_out, L, K = 2, 4, 8, 16, 3
    pad = K // 2

    x = jax.random.normal(k1, (B, C_in, L), dtype=jnp.float32)
    weight = jax.random.normal(k2, (C_out, C_in, K), dtype=jnp.float32) * 0.3
    gamma = 1.0 + 0.1 * jax.random.normal(k3, (C_out,), dtype=jnp.float32)
    beta = 0.1 * jax.random.normal(k4, (C_out,), dtype=jnp.float32)

    out = conv_block_1d(x, weight, gamma, beta)
    jax.block_until_ready(out)

    # Pure-JAX reference of the same forward semantics (training-mode BN stats).
    def _ref(x, w, g, b, eps=1e-5):
        y = jax.lax.conv_general_dilated(
            x, w, window_strides=(1,), padding=[(pad, pad)],
            dimension_numbers=("NCH", "OIH", "NCH"))
        mean = jnp.mean(y, axis=(0, 2), keepdims=True)
        var = jnp.mean((y - mean) ** 2, axis=(0, 2), keepdims=True)
        yn = (y - mean) / jnp.sqrt(var + eps)
        return jnp.maximum(yn * g[None, :, None] + b[None, :, None], 0.0)

    ref = _ref(x, weight, gamma, beta)
    assert out.shape == ref.shape, (out.shape, ref.shape)
    assert jnp.allclose(out, ref, atol=1e-4, rtol=1e-4), (
        float(jnp.max(jnp.abs(out - ref))))

    print("KERNEL_OK")
</pallas_src>

<mosaic_0001>
module attributes {stable_mosaic.version = 11 : i64} {
  func.func @_stats_kernel(%arg0: i32, %arg1: memref<2x4x16xf32, #tpu.memory_space<vmem>>, %arg2: memref<3x8x4xf32, #tpu.memory_space<vmem>>, %arg3: memref<1x8x1xf32, #tpu.memory_space<vmem>>, %arg4: memref<1x8x1xf32, #tpu.memory_space<vmem>>) attributes {dimension_semantics = [#tpu.dimension_semantics<parallel>], iteration_bounds = array<i64: 1>, scalar_prefetch = 0 : i64, scratch_operands = 0 : i64, tpu.core_type = #tpu.core_type<tc>, window_params = [{transform_indices = @transform_0, window_bounds = array<i64: 2, 4, 16>}, {pipeline_mode = #tpu.pipeline_mode<synchronous>, transform_indices = @transform_1, window_bounds = array<i64: 3, 8, 4>}, {transform_indices = @transform_2, window_bounds = array<i64: 1, 8, 1>}, {transform_indices = @transform_3, window_bounds = array<i64: 1, 8, 1>}]} {
    %c0 = arith.constant 0 : index
    %c0_0 = arith.constant 0 : index
    %c0_1 = arith.constant 0 : index
    %0 = vector.load %arg1[%c0, %c0_0, %c0_1] : memref<2x4x16xf32, #tpu.memory_space<vmem>>, vector<2x4x16xf32>
    %cst = arith.constant 0.000000e+00 : f32
    %1 = vector.broadcast %cst : f32 to vector<2x4x1xf32>
    %2 = vector.extract_strided_slice %0 {offsets = [0, 0, 0], sizes = [2, 4, 15], strides = [1, 1, 1]} : vector<2x4x16xf32> to vector<2x4x15xf32>
    %3 = tpu.concatenate %1, %2 in 2 : vector<2x4x1xf32>, vector<2x4x15xf32> -> vector<2x4x16xf32>
    %cst_2 = arith.constant 0.000000e+00 : f32
    %4 = vector.broadcast %cst_2 : f32 to vector<2x4x1xf32>
    %5 = vector.extract_strided_slice %0 {offsets = [0, 0, 1], sizes = [2, 4, 15], strides = [1, 1, 1]} : vector<2x4x16xf32> to vector<2x4x15xf32>
    %6 = tpu.concatenate %5, %4 in 2 : vector<2x4x15xf32>, vector<2x4x1xf32> -> vector<2x4x16xf32>
    %c0_3 = arith.constant 0 : index
    %c0_4 = arith.constant 0 : index
    %c0_5 = arith.constant 0 : index
    %7 = vector.load %arg2[%c0_3, %c0_4, %c0_5] : memref<3x8x4xf32, #tpu.memory_space<vmem>>, vector<1x8x4xf32>
    %8 = vector.shape_cast %7 : vector<1x8x4xf32> to vector<8x4xf32>
    %9 = vector.extract_strided_slice %3 {offsets = [0, 0, 0], sizes = [1, 4, 16], strides = [1, 1, 1]} : vector<2x4x16xf32> to vector<1x4x16xf32>
    %10 = vector.shape_cast %9 : vector<1x4x16xf32> to vector<4x16xf32>
    %cst_6 = arith.constant dense<0.000000e+00> : vector<8x16xf32>
    %11 = tpu.matmul %8, %10, %cst_6 {dimension_numbers = #tpu.dot_dimension_numbers<[1], [0], [0], [1], [0, 0, 1, 1], [], []>} : vector<8x4xf32>, vector<4x16xf32>, vector<8x16xf32> -> vector<8x16xf32>
    %c1 = arith.constant 1 : index
    %c0_7 = arith.constant 0 : index
    %c0_8 = arith.constant 0 : index
    %12 = vector.load %arg2[%c1, %c0_7, %c0_8] : memref<3x8x4xf32, #tpu.memory_space<vmem>>, vector<1x8x4xf32>
    %13 = vector.shape_cast %12 : vector<1x8x4xf32> to vector<8x4xf32>
    %14 = vector.extract_strided_slice %0 {offsets = [0, 0, 0], sizes = [1, 4, 16], strides = [1, 1, 1]} : vector<2x4x16xf32> to vector<1x4x16xf32>
    %15 = vector.shape_cast %14 : vector<1x4x16xf32> to vector<4x16xf32>
    %cst_9 = arith.constant dense<0.000000e+00> : vector<8x16xf32>
    %16 = tpu.matmul %13, %15, %cst_9 {dimension_numbers = #tpu.dot_dimension_numbers<[1], [0], [0], [1], [0, 0, 1, 1], [], []>} : vector<8x4xf32>, vector<4x16xf32>, vector<8x16xf32> -> vector<8x16xf32>
    %17 = arith.addf %11, %16 : vector<8x16xf32>
    %c2 = arith.constant 2 : index
    %c0_10 = arith.constant 0 : index
    %c0_11 = arith.constant 0 : index
    %18 = vector.load %arg2[%c2, %c0_10, %c0_11] : memref<3x8x4xf32, #tpu.memory_space<vmem>>, vector<1x8x4xf32>
    %19 = vector.shape_cast %18 : vector<1x8x4xf32> to vector<8x4xf32>
    %20 = vector.extract_strided_slice %6 {offsets = [0, 0, 0], sizes = [1, 4, 16], strides = [1, 1, 1]} : vector<2x4x16xf32> to vector<1x4x16xf32>
    %21 = vector.shape_cast %20 : vector<1x4x16xf32> to vector<4x16xf32>
    %cst_12 = arith.constant dense<0.000000e+00> : vector<8x16xf32>
    %22 = tpu.matmul %19, %21, %cst_12 {dimension_numbers = #tpu.dot_dimension_numbers<[1], [0], [0], [1], [0, 0, 1, 1], [], []>} : vector<8x4xf32>, vector<4x16xf32>, vector<8x16xf32> -> vector<8x16xf32>
    %23 = arith.addf %17, %22 : vector<8x16xf32>
    %cst_13 = arith.constant dense<0.000000e+00> : vector<8xf32>
    %24 = vector.multi_reduction <add>, %23, %cst_13 [1] : vector<8x16xf32> to vector<8xf32>
    %25 = vector.shape_cast %24 : vector<8xf32> to vector<8x1xf32>
    %26 = arith.mulf %23, %23 : vector<8x16xf32>
    %cst_14 = arith.constant dense<0.000000e+00> : vector<8xf32>
    %27 = vector.multi_reduction <add>, %26, %cst_14 [1] : vector<8x16xf32> to vector<8xf32>
    %28 = vector.shape_cast %27 : vector<8xf32> to vector<8x1xf32>
    %c0_15 = arith.constant 0 : index
    %c0_16 = arith.constant 0 : index
    %c0_17 = arith.constant 0 : index
    %29 = vector.load %arg2[%c0_15, %c0_16, %c0_17] : memref<3x8x4xf32, #tpu.memory_space<vmem>>, vector<1x8x4xf32>
    %30 = vector.shape_cast %29 : vector<1x8x4xf32> to vector<8x4xf32>
    %31 = vector.extract_strided_slice %3 {offsets = [1, 0, 0], sizes = [1, 4, 16], strides = [1, 1, 1]} : vector<2x4x16xf32> to vector<1x4x16xf32>
    %32 = vector.shape_cast %31 : vector<1x4x16xf32> to vector<4x16xf32>
    %cst_18 = arith.constant dense<0.000000e+00> : vector<8x16xf32>
    %33 = tpu.matmul %30, %32, %cst_18 {dimension_numbers = #tpu.dot_dimension_numbers<[1], [0], [0], [1], [0, 0, 1, 1], [], []>} : vector<8x4xf32>, vector<4x16xf32>, vector<8x16xf32> -> vector<8x16xf32>
    %c1_19 = arith.constant 1 : index
    %c0_20 = arith.constant 0 : index
    %c0_21 = arith.constant 0 : index
    %34 = vector.load %arg2[%c1_19, %c0_20, %c0_21] : memref<3x8x4xf32, #tpu.memory_space<vmem>>, vector<1x8x4xf32>
    %35 = vector.shape_cast %34 : vector<1x8x4xf32> to vector<8x4xf32>
    %36 = vector.extract_strided_slice %0 {offsets = [1, 0, 0], sizes = [1, 4, 16], strides = [1, 1, 1]} : vector<2x4x16xf32> to vector<1x4x16xf32>
    %37 = vector.shape_cast %36 : vector<1x4x16xf32> to vector<4x16xf32>
    %cst_22 = arith.constant dense<0.000000e+00> : vector<8x16xf32>
    %38 = tpu.matmul %35, %37, %cst_22 {dimension_numbers = #tpu.dot_dimension_numbers<[1], [0], [0], [1], [0, 0, 1, 1], [], []>} : vector<8x4xf32>, vector<4x16xf32>, vector<8x16xf32> -> vector<8x16xf32>
    %39 = arith.addf %33, %38 : vector<8x16xf32>
    %c2_23 = arith.constant 2 : index
    %c0_24 = arith.constant 0 : index
    %c0_25 = arith.constant 0 : index
    %40 = vector.load %arg2[%c2_23, %c0_24, %c0_25] : memref<3x8x4xf32, #tpu.memory_space<vmem>>, vector<1x8x4xf32>
    %41 = vector.shape_cast %40 : vector<1x8x4xf32> to vector<8x4xf32>
    %42 = vector.extract_strided_slice %6 {offsets = [1, 0, 0], sizes = [1, 4, 16], strides = [1, 1, 1]} : vector<2x4x16xf32> to vector<1x4x16xf32>
    %43 = vector.shape_cast %42 : vector<1x4x16xf32> to vector<4x16xf32>
    %cst_26 = arith.constant dense<0.000000e+00> : vector<8x16xf32>
    %44 = tpu.matmul %41, %43, %cst_26 {dimension_numbers = #tpu.dot_dimension_numbers<[1], [0], [0], [1], [0, 0, 1, 1], [], []>} : vector<8x4xf32>, vector<4x16xf32>, vector<8x16xf32> -> vector<8x16xf32>
    %45 = arith.addf %39, %44 : vector<8x16xf32>
    %cst_27 = arith.constant dense<0.000000e+00> : vector<8xf32>
    %46 = vector.multi_reduction <add>, %45, %cst_27 [1] : vector<8x16xf32> to vector<8xf32>
    %47 = vector.shape_cast %46 : vector<8xf32> to vector<8x1xf32>
    %48 = arith.mulf %45, %45 : vector<8x16xf32>
    %cst_28 = arith.constant dense<0.000000e+00> : vector<8xf32>
    %49 = vector.multi_reduction <add>, %48, %cst_28 [1] : vector<8x16xf32> to vector<8xf32>
    %50 = vector.shape_cast %49 : vector<8xf32> to vector<8x1xf32>
    %51 = arith.addf %25, %47 : vector<8x1xf32>
    %52 = arith.addf %28, %50 : vector<8x1xf32>
    %c0_29 = arith.constant 0 : index
    %c0_30 = arith.constant 0 : index
    %c0_31 = arith.constant 0 : index
    %53 = vector.load %arg3[%c0_29, %c0_30, %c0_31] : memref<1x8x1xf32, #tpu.memory_space<vmem>>, vector<1x8x1xf32>
    %54 = vector.shape_cast %53 : vector<1x8x1xf32> to vector<8x1xf32>
    %55 = vector.shape_cast %51 : vector<8x1xf32> to vector<1x8x1xf32>
    tpu.vector_store %arg3[%c0_29, %c0_30, %c0_31], %55 {strides = array<i32>} : memref<1x8x1xf32, #tpu.memory_space<vmem>>, vector<1x8x1xf32>,
    %c0_32 = arith.constant 0 : index
    %c0_33 = arith.constant 0 : index
    %c0_34 = arith.constant 0 : index
    %56 = vector.load %arg4[%c0_32, %c0_33, %c0_34] : memref<1x8x1xf32, #tpu.memory_space<vmem>>, vector<1x8x1xf32>
    %57 = vector.shape_cast %56 : vector<1x8x1xf32> to vector<8x1xf32>
    %58 = vector.shape_cast %52 : vector<8x1xf32> to vector<1x8x1xf32>
    tpu.vector_store %arg4[%c0_32, %c0_33, %c0_34], %58 {strides = array<i32>} : memref<1x8x1xf32, #tpu.memory_space<vmem>>, vector<1x8x1xf32>,
    return
  }
  func.func @transform_0(%arg0: i32) -> (i32, i32, i32) {
    %c0_i32 = arith.constant 0 : i32
    %c0_i32_0 = arith.constant 0 : i32
    %c0_i32_1 = arith.constant 0 : i32
    return %arg0, %c0_i32, %c0_i32_0 : i32, i32, i32
  }
  func.func @transform_1(%arg0: i32) -> (i32, i32, i32) {
    %c0_i32 = arith.constant 0 : i32
    %c0_i32_0 = arith.constant 0 : i32
    %c0_i32_1 = arith.constant 0 : i32
    %c0_i32_2 = arith.constant 0 : i32
    return %c0_i32, %c0_i32_0, %c0_i32_1 : i32, i32, i32
  }
  func.func @transform_2(%arg0: i32) -> (i32, i32, i32) {
    %c0_i32 = arith.constant 0 : i32
    %c0_i32_0 = arith.constant 0 : i32
    %c0_i32_1 = arith.constant 0 : i32
    return %arg0, %c0_i32, %c0_i32_0 : i32, i32, i32
  }
  func.func @transform_3(%arg0: i32) -> (i32, i32, i32) {
    %c0_i32 = arith.constant 0 : i32
    %c0_i32_0 = arith.constant 0 : i32
    %c0_i32_1 = arith.constant 0 : i32
    return %arg0, %c0_i32, %c0_i32_0 : i32, i32, i32
  }
}

</mosaic_0001>

<bundles_post_ra>
// kernel: tpu_custom_call.1
= control target key start
LH: loop header
LB: loop body
LE: loop exit
PB: predicated region body
PF: predicated region fallthrough
CT: control target
= control target key end

     0   :  { %vm42_vm0 = vcmask 1043456   ;;  %v584_v1 = vmov 0.0   ;;  %vm585_vm1 = vmmov 0   ;;  %vm38_vm2 = vcmask 31744   ;;  %s586_s16 = smov 1   ;;  %s587_s17 = smov 127   ;;  %s651_s0 = inlined_call_operand.vmem [shape: f32[2,4,16], index: 0, kind: input, shape index: {}]   ;;  %s652_s1 = inlined_call_operand.vmem [shape: f32[3,8,4], index: 1, kind: input, shape index: {}]   ;;  %s653_s2 = inlined_call_operand.vmem [shape: f32[1,8,1], index: 2, kind: output, shape index: {0}]   ;;  %s654_s3 = inlined_call_operand.vmem [shape: f32[1,8,1], index: 3, kind: output, shape index: {1}]  }
   0x1   :  { %v13_v0 = vld [vmem:[%s651_s0] sm:$0xf]  ;;  %542 = vmatprep.subr.mxu0 %v584_v1  ;;  %544 = vmatprep.mubr.msk.f32.mxu0 %vm585_vm1, %v584_v1  ;;  %v516_v2 = vld [vmem:[%s652_s1 + $0x8] sm:$0xff]  ;;  %v14_v3 = vld [vmem:[%s651_s0 + $0x4] sm:$0xf]  ;;  %vm23_vm3 = vcmask 7168  }
   0x2   :  { %17 = vrot.lane.b32.xlu0 %v13_v0, %s586_s16  ;;  %26 = vrot.lane.b32.xlu1 %v13_v0, %s587_s17  ;;  %vm32_vm4 = vcmask 121856   ;;  %v35_v5 = vld [vmem:[%s652_s1] sm:$0xff]  ;;  %v521_v13 = vld [vmem:[%s652_s1 + $0x10] sm:$0xff]  ;;  %vm270_vm5 = vcmask 130048  }
   0x3   :  { %543 = vmatpush3.msk.msra.mxu0 %vm42_vm0, %v13_v0  ;;  %557 = vmatprep.subr.mxu1 %v584_v1 }
   0x4   :  { %545 = vmatmul.mubr.msk.f32.vlgmr.msra.gmra.mrb[0].mxu0 %vm38_vm2, %v516_v2  ;;  %558 = vmatpush3.msk.msra.mxu1 %vm42_vm0, %v14_v3 }
   0x5   :  { %559 = vmatprep.mubr.msk.f32.mxu1 %vm585_vm1, %v584_v1  ;;  %547 = vmatprep.subr.mxu0 %v584_v1 }
   0x6   :  { %19 = vrot.lane.b32.xlu0 %v14_v3, %s586_s16  ;;  %28 = vrot.lane.b32.xlu1 %v14_v3, %s587_s17 }
   0x7   :  { %560 = vmatmul.mubr.msk.f32.vlgmr.msra.gmra.mrb[0].mxu1 %vm38_vm2, %v516_v2  ;;  %549 = vmatprep.mubr.msk.f32.mxu0 %vm585_vm1, %v584_v1 }
   0x8   :  { %562 = vmatprep.subr.mxu1 %v584_v1  ;;  %564 = vmatprep.mubr.msk.f32.mxu1 %vm585_vm1, %v584_v1 }
  0x74   :  { %v18_v4 = vpop.permute.xlu0 %17  ;;  %v27_v6 = vpop.permute.xlu1 %26 }
  0x75   :  { %v24_v7 = vsel %vm23_vm3, 0.0, %v18_v4  ;;  %v33_v8 = vsel %vm32_vm4, %v27_v6, 0.0 }
  0x76   :  { %548 = vmatpush3.msk.msra.mxu0 %vm42_vm0, %v24_v7 }
  0x77   :  { %550 = vmatmul.mubr.msk.f32.vlgmr.msra.gmra.mrb[0].mxu0 %vm38_vm2, %v35_v5  ;;  %552 = vmatprep.subr.mxu0 %v584_v1 }
  0x78   :  { %v20_v9 = vpop.permute.xlu0 %19  ;;  %553 = vmatpush3.msk.msra.mxu0 %vm42_vm0, %v33_v8  ;;  %554 = vmatprep.mubr.msk.f32.mxu0 %vm585_vm1, %v584_v1  ;;  %v29_v10 = vpop.permute.xlu1 %28 }
  0x79   :  { %v25_v11 = vsel %vm23_vm3, 0.0, %v20_v9  ;;  %v34_v12 = vsel %vm32_vm4, %v29_v10, 0.0 }
  0x7a   :  { %563 = vmatpush3.msk.msra.mxu1 %vm42_vm0, %v25_v11 }
  0x7b   :  { %565 = vmatmul.mubr.msk.f32.vlgmr.msra.gmra.mrb[0].mxu1 %vm38_vm2, %v35_v5  ;;  %567 = vmatprep.subr.mxu1 %v584_v1 }
  0x7c   :  { %568 = vmatpush3.msk.msra.mxu1 %vm42_vm0, %v34_v12  ;;  %569 = vmatprep.mubr.msk.f32.mxu1 %vm585_vm1, %v584_v1 }
  0x7f   :  { %555 = vmatmul.mubr.msk.f32.vlgmr.msra.gmra.mrb[0].mxu0 %vm38_vm2, %v521_v13 }
  0x83   :  { %570 = vmatmul.mubr.msk.f32.vlgmr.msra.gmra.mrb[0].mxu1 %vm38_vm2, %v521_v13 }
 0x152   :  { %v265_v14 = vpop.f32.mrb[0].mxu0 }
 0x153   :  { %v274_v15 = vmul.f32 %v265_v14, %v265_v14  ;;  %v556_v16 = vpop.f32.mrb[1].mxu0  ;;  %v271_v17 = vsel %vm270_vm5, %v265_v14, 0.0 }
 0x154   :  { %272 = vadd.xlane.f32.xlu0 %v271_v17 }
 0x155   :  { %v275_v18 = vsel %vm270_vm5, %v274_v15, 0.0 }
 0x156   :  { %v492_v19 = vpop.f32.mrb[0].mxu1  ;;  %276 = vadd.xlane.f32.xlu1 %v275_v18 }
 0x157   :  { %v500_v20 = vmul.f32 %v492_v19, %v492_v19  ;;  %v571_v21 = vpop.f32.mrb[1].mxu1  ;;  %v497_v22 = vsel %vm270_vm5, %v492_v19, 0.0 }
 0x158   :  { %498 = vadd.xlane.f32.xlu0 %v497_v22 }
 0x159   :  { %v501_v23 = vsel %vm270_vm5, %v500_v20, 0.0 }
 0x15c   :  { %502 = vadd.xlane.f32.xlu0 %v501_v23 }
 0x1e1   :  { %v273_v24 = vpop.xlane.xlu0 %272 }
 0x1e3   :  { %v277_v27 = vpop.xlane.xlu1 %276 }
 0x1e5   :  { %v499_v25 = vpop.xlane.xlu0 %498 }
 0x1e6   :  { %v504_v26 = vadd.f32 %v499_v25, %v273_v24 }
 0x1e8   :  { %506 = vst.msk [vmem:[%s653_s2] sm:$0xff] %vm23_vm3, %v504_v26 }
 0x1e9   :  { %v503_v28 = vpop.xlane.xlu0 %502 }
 0x1ea   :  { %v505_v29 = vadd.f32 %v503_v28, %v277_v27 }
 0x1ec   :  { %507 = vst.msk [vmem:[%s654_s3] sm:$0xff] %vm23_vm3, %v505_v29 }

</bundles_post_ra>
